<compile_context>
chip_gen: v5e
topology: v5e:2x2
jax: 0.10.0
libtpu: 0.0.40
codegen_flags: <defaults>
</compile_context>

<pallas_src>
import jax
import jax.numpy as jnp
from jax.experimental import pallas as pl
from jax.experimental.pallas import tpu as pltpu

N_CLASSES = 20
S_THRESH = 0.31
ENC_OUT = 128          # input_size = (64, 128, 4, 4)
PATCH = 4
N_PAD = 128            # lane-dense head width: cols [0,20)=cls, [20,40)=flow, rest 0


# ----------------------------- fused kernel -------------------------------- #

def fused_kernel(pairs_ref, w_enc2_ref, b_enc2_ref, w_head_ref, b_head_ref, preds_ref):
    """Conv(k=4,s=4)-as-patch-matmul + ReLU + fused cls/flow heads + OOD gating.

    pairs : (n_pairs, TB, 128) bf16  -- two 64-feature patches packed per row,
                                        pair-major so rows flatten contiguously
    w_enc2: (128, 256) bf16          -- block-diag encoder weight (one per packed patch)
    b_enc2: (1, 256) f32
    w_head: (2048, 128) bf16         -- patch-major rows; cls cols [0,20), folded flow [20,40)
    b_head: (1, 128) f32
    preds : (TB, 128) f32            -- lane-dense, sliced to 20 cols by the wrapper
    """
    n_pairs, tb, pair_w = pairs_ref.shape
    enc2_n = w_enc2_ref.shape[1]

    # --- encoder: ONE MXU contraction, M = n_pairs*TB, K = 128, N = 256 ---
    # Leading-dim merge only (tb % 8 == 0, lane dim unchanged) -> no relayout.
    x = pairs_ref[...].reshape(n_pairs * tb, pair_w)
    enc = jnp.dot(x, w_enc2_ref[...], preferred_element_type=jnp.float32)
    enc = jnp.maximum(enc + b_enc2_ref[...], 0.0)        # bias + ReLU once over the slab
    enc_bf = enc.astype(jnp.bfloat16)                    # (n_pairs*TB, 256)

    # --- fused cls+flow head: n_pairs pushes with K = 256 (matches MXU depth) ---
    acc = jnp.zeros((tb, preds_ref.shape[1]), jnp.float32)
    for q in range(n_pairs):                             # static 8-way unroll
        acc = acc + jnp.dot(enc_bf[q * tb:(q + 1) * tb, :],
                            w_head_ref[q * enc2_n:(q + 1) * enc2_n, :],
                            preferred_element_type=jnp.float32)
    logits = acc + b_head_ref[...]                       # (TB, 128) f32

    col = jax.lax.broadcasted_iota(jnp.int32, logits.shape, 1)
    cls_mask = col < N_CLASSES
    flow_mask = (col >= N_CLASSES) & (col < 2 * N_CLASSES)

    def masked_softmax(mask):
        ml = jnp.where(mask, logits, -1e30)
        m = jnp.max(ml, axis=-1, keepdims=True)
        e = jnp.where(mask, jnp.exp(ml - m), 0.0)
        return e / jnp.sum(e, axis=-1, keepdims=True)

    cls_probs = masked_softmax(cls_mask)                 # zeros outside cols [0, 20)
    flow_probs = masked_softmax(flow_mask)

    pred_max = jnp.max(cls_probs, axis=-1, keepdims=True)
    tau = jnp.min(jnp.where(flow_mask, flow_probs, 1.0), axis=-1, keepdims=True)
    keep = pred_max >= tau + S_THRESH                    # zero row iff predicted < tau + s
    preds_ref[...] = jnp.where(keep, cls_probs, 0.0)


# ----------------------------- params -------------------------------------- #

def init_params(key):
    """Original-semantics (NCHW-ordered) f32 parameters of the synthetic sub-modules."""
    D = ENC_OUT * 16  # 128 * 4 * 4
    ks = jax.random.split(key, 6)
    return dict(
        w_enc=jax.random.normal(ks[0], (4 * 4 * 4, ENC_OUT), jnp.float32) / 8.0,
        b_enc=0.1 * jax.random.normal(ks[1], (1, ENC_OUT), jnp.float32),
        w_cls=jax.random.normal(ks[2], (D, N_CLASSES), jnp.float32) * 0.05,
        b_cls=jnp.zeros((1, N_CLASSES), jnp.float32),
        log_scale=0.1 * jax.random.normal(ks[3], (1, D), jnp.float32),
        shift=0.1 * jax.random.normal(ks[4], (1, D), jnp.float32),
        w_flow=jax.random.normal(ks[5], (D, N_CLASSES), jnp.float32) * 0.05,
        b_flow=jnp.zeros((1, N_CLASSES), jnp.float32),
    )


def _nchw_rows_to_patch_major(w, n_pos):
    # PyTorch's x.view(-1,128,4,4) flattens features as c*16 + p; the fused kernel
    # consumes them patch-major (p*128 + c).  Permute weight rows once at init.
    D, N = w.shape
    return w.reshape(ENC_OUT, n_pos, N).transpose(1, 0, 2).reshape(D, N)


def prepare_kernel_params(p, n_pos=16):
    D = ENC_OUT * n_pos
    ckk = p["w_enc"].shape[0]  # 64 = C*K*K

    # Block-diagonal encoder weight: two packed patches per row -> K=128, N=256 push.
    w_enc2 = jnp.zeros((2 * ckk, 2 * ENC_OUT), jnp.float32)
    w_enc2 = w_enc2.at[:ckk, :ENC_OUT].set(p["w_enc"])
    w_enc2 = w_enc2.at[ckk:, ENC_OUT:].set(p["w_enc"])
    b_enc2 = jnp.concatenate([p["b_enc"], p["b_enc"]], axis=1)  # (1, 256)

    # Exact fold of the flow affine:  z @ Wf + bf == x @ (exp(ls).T * Wf) + (bf + shift @ Wf)
    w_flow_f = jnp.exp(p["log_scale"]).T * p["w_flow"]
    b_flow_f = p["b_flow"] + p["shift"] @ p["w_flow"]

    w_cls_pm = _nchw_rows_to_patch_major(p["w_cls"], n_pos)
    w_flow_pm = _nchw_rows_to_patch_major(w_flow_f, n_pos)

    w_head = jnp.zeros((D, N_PAD), jnp.float32)
    w_head = w_head.at[:, :N_CLASSES].set(w_cls_pm)
    w_head = w_head.at[:, N_CLASSES:2 * N_CLASSES].set(w_flow_pm)
    b_head = jnp.zeros((1, N_PAD), jnp.float32)
    b_head = b_head.at[:, :N_CLASSES].set(p["b_cls"])
    b_head = b_head.at[:, N_CLASSES:2 * N_CLASSES].set(b_flow_f)

    return dict(
        w_enc2=w_enc2.astype(jnp.bfloat16),
        b_enc2=b_enc2,
        w_head=w_head.astype(jnp.bfloat16),
        b_head=b_head,
    )


# ----------------------------- wrapper -------------------------------------- #

def _ceil_div(a, b):
    return -(-a // b)


def _batch_tile(B):
    """Batch tile: <=128 rows (vreg residency), sublane-aligned, >=2 grid steps when B>8."""
    if B <= 8:
        return 8
    n_steps = max(2, _ceil_div(B, 128))
    return min(128, _ceil_div(_ceil_div(B, n_steps), 8) * 8)


def hybrid_forward(x, kp):
    B, C, H, W = x.shape
    K = PATCH
    HP, WP = H // K, W // K
    n_pos = HP * WP
    assert n_pos % 2 == 0
    n_pairs = n_pos // 2
    pair_w = 2 * C * K * K  # 128: two 64-feature patches packed lane-dense per row

    # conv(k=4,s=4) == non-overlapping 4x4 patch extraction; pack 2 patches per row
    # and lay out pair-major so the kernel's encoder matmul sees one contiguous
    # (n_pairs*TB, 128) operand.  Pure layout glue in XLA.
    pairs = (x.reshape(B, C, HP, K, WP, K)
              .transpose(0, 2, 4, 1, 3, 5)
              .reshape(B, n_pairs, pair_w)
              .transpose(1, 0, 2)
              .astype(jnp.bfloat16))                      # (n_pairs, B, 128)

    TB = _batch_tile(B)
    steps = _ceil_div(B, TB)
    B_pad = steps * TB
    if B_pad != B:                                        # pad-to-tile, slice at the end
        pairs = jnp.pad(pairs, ((0, 0), (0, B_pad - B), (0, 0)))

    preds_pad = pl.pallas_call(
        fused_kernel,
        out_shape=jax.ShapeDtypeStruct((B_pad, N_PAD), jnp.float32),
        grid=(steps,),
        in_specs=[
            pl.BlockSpec((n_pairs, TB, pair_w), lambda i: (0, i, 0)),
            pl.BlockSpec((pair_w, 2 * ENC_OUT), lambda i: (0, 0)),
            pl.BlockSpec((1, 2 * ENC_OUT), lambda i: (0, 0)),
            pl.BlockSpec((n_pos * ENC_OUT, N_PAD), lambda i: (0, 0)),
            pl.BlockSpec((1, N_PAD), lambda i: (0, 0)),
        ],
        out_specs=pl.BlockSpec((TB, N_PAD), lambda i: (i, 0)),
        compiler_params=pltpu.CompilerParams(dimension_semantics=("parallel",)),
    )(pairs, kp["w_enc2"], kp["b_enc2"], kp["w_head"], kp["b_head"])
    return preds_pad[:B, :N_CLASSES]   # forward returns only the gated cls_preds


# ----------------------------- reference ------------------------------------ #

def reference_forward(x, kp):
    """Plain-JAX reference in matching precision (bf16 MXU operands, f32 accumulate)."""
    B, C, H, W = x.shape
    K = PATCH
    HP, WP = H // K, W // K
    n_pos = HP * WP
    n_pairs = n_pos // 2
    pairs = (x.reshape(B, C, HP, K, WP, K)
              .transpose(0, 2, 4, 1, 3, 5)
              .reshape(B, n_pairs, 2 * C * K * K)
              .astype(jnp.bfloat16))                      # (B, 8, 128)
    enc = jnp.einsum("bqk,kn->bqn", pairs, kp["w_enc2"],
                     preferred_element_type=jnp.float32) + kp["b_enc2"]
    enc = jnp.maximum(enc, 0.0)                           # (B, 8, 256)
    feat = enc.reshape(B, n_pos * ENC_OUT).astype(jnp.bfloat16)   # patch-major flatten
    logits = jnp.dot(feat, kp["w_head"], preferred_element_type=jnp.float32) + kp["b_head"]
    cls_probs = jax.nn.softmax(logits[:, :N_CLASSES], axis=1)
    flow_probs = jax.nn.softmax(logits[:, N_CLASSES:2 * N_CLASSES], axis=1)
    tau = jnp.min(flow_probs, axis=1, keepdims=True)
    keep = jnp.max(cls_probs, axis=1, keepdims=True) >= tau + S_THRESH
    return jnp.where(keep, cls_probs, 0.0)


if __name__ == "__main__":
    key = jax.random.PRNGKey(0)
    kx, kparam, ktest, kx2 = jax.random.split(key, 4)
    params = init_params(kparam)
    kparams = prepare_kernel_params(params)

    # (a) small shape consistent with the module: encoder input (B,4,16,16) -> (B,128,4,4)
    x = jax.random.normal(kx, (2, 4, 16, 16), jnp.float32)
    out = jax.block_until_ready(jax.jit(hybrid_forward)(x, kparams))
    ref = reference_forward(x, kparams)
    assert out.shape == (2, N_CLASSES), out.shape
    assert jnp.allclose(out, ref, rtol=1e-4, atol=1e-4), (out, ref)

    # (b) non-divisible batch: exercises pad-to-tile + multi-step "parallel" grid
    x2 = jax.random.normal(kx2, (20, 4, 16, 16), jnp.float32)
    out2 = jax.block_until_ready(jax.jit(hybrid_forward)(x2, kparams))
    ref2 = reference_forward(x2, kparams)
    assert out2.shape == (20, N_CLASSES), out2.shape
    assert jnp.allclose(out2, ref2, rtol=1e-4, atol=1e-4), (out2, ref2)

    # (c) the flow-affine fold used by prepare_kernel_params is algebraically exact (f32)
    D = ENC_OUT * 16
    ftest = jax.random.normal(ktest, (4, D), jnp.float32)
    z = ftest * jnp.exp(params["log_scale"]) + params["shift"]
    lhs = z @ params["w_flow"] + params["b_flow"]
    rhs = (ftest @ (jnp.exp(params["log_scale"]).T * params["w_flow"])
           + (params["b_flow"] + params["shift"] @ params["w_flow"]))
    assert jnp.allclose(lhs, rhs, rtol=1e-4, atol=1e-3), (lhs, rhs)

    print("KERNEL_OK")
</pallas_src>

<mosaic_0001>
module attributes {stable_mosaic.version = 11 : i64} {
  func.func @fused_kernel(%arg0: i32, %arg1: memref<8x8x128xbf16, #tpu.memory_space<vmem>>, %arg2: memref<128x256xbf16, #tpu.memory_space<vmem>>, %arg3: memref<1x256xf32, #tpu.memory_space<vmem>>, %arg4: memref<2048x128xbf16, #tpu.memory_space<vmem>>, %arg5: memref<1x128xf32, #tpu.memory_space<vmem>>, %arg6: memref<8x128xf32, #tpu.memory_space<vmem>>) attributes {dimension_semantics = [#tpu.dimension_semantics<parallel>], iteration_bounds = array<i64: 1>, scalar_prefetch = 0 : i64, scratch_operands = 0 : i64, tpu.core_type = #tpu.core_type<tc>, window_params = [{transform_indices = @transform_0, window_bounds = array<i64: 8, 8, 128>}, {pipeline_mode = #tpu.pipeline_mode<synchronous>, transform_indices = @transform_1, window_bounds = array<i64: 128, 256>}, {pipeline_mode = #tpu.pipeline_mode<synchronous>, transform_indices = @transform_2, window_bounds = array<i64: 1, 256>}, {pipeline_mode = #tpu.pipeline_mode<synchronous>, transform_indices = @transform_3, window_bounds = array<i64: 2048, 128>}, {pipeline_mode = #tpu.pipeline_mode<synchronous>, transform_indices = @transform_4, window_bounds = array<i64: 1, 128>}, {transform_indices = @transform_5, window_bounds = array<i64: 8, 128>}]} {
    %c0 = arith.constant 0 : index
    %c0_0 = arith.constant 0 : index
    %c0_1 = arith.constant 0 : index
    %0 = vector.load %arg1[%c0, %c0_0, %c0_1] : memref<8x8x128xbf16, #tpu.memory_space<vmem>>, vector<8x8x128xbf16>
    %1 = vector.shape_cast %0 : vector<8x8x128xbf16> to vector<64x128xbf16>
    %c0_2 = arith.constant 0 : index
    %c0_3 = arith.constant 0 : index
    %2 = vector.load %arg2[%c0_2, %c0_3] : memref<128x256xbf16, #tpu.memory_space<vmem>>, vector<128x256xbf16>
    %cst = arith.constant dense<0.000000e+00> : vector<64x256xf32>
    %3 = tpu.matmul %1, %2, %cst {dimension_numbers = #tpu.dot_dimension_numbers<[1], [0], [0], [1], [0, 0, 1, 1], [], []>} : vector<64x128xbf16>, vector<128x256xbf16>, vector<64x256xf32> -> vector<64x256xf32>
    %c0_4 = arith.constant 0 : index
    %c0_5 = arith.constant 0 : index
    %4 = vector.load %arg3[%c0_4, %c0_5] : memref<1x256xf32, #tpu.memory_space<vmem>>, vector<1x256xf32>
    %5 = vector.broadcast %4 : vector<1x256xf32> to vector<64x256xf32>
    %6 = arith.addf %3, %5 : vector<64x256xf32>
    %cst_6 = arith.constant 0.000000e+00 : f32
    %7 = vector.broadcast %cst_6 : f32 to vector<64x256xf32>
    %8 = arith.maximumf %6, %7 : vector<64x256xf32>
    %9 = arith.truncf %8 : vector<64x256xf32> to vector<64x256xbf16>
    %cst_7 = arith.constant 0.000000e+00 : f32
    %10 = vector.broadcast %cst_7 : f32 to vector<8x128xf32>
    %11 = vector.extract_strided_slice %9 {offsets = [0, 0], sizes = [8, 256], strides = [1, 1]} : vector<64x256xbf16> to vector<8x256xbf16>
    %c0_8 = arith.constant 0 : index
    %c0_9 = arith.constant 0 : index
    %12 = vector.load %arg4[%c0_8, %c0_9] : memref<2048x128xbf16, #tpu.memory_space<vmem>>, vector<256x128xbf16>
    %cst_10 = arith.constant dense<0.000000e+00> : vector<8x128xf32>
    %13 = tpu.matmul %11, %12, %cst_10 {dimension_numbers = #tpu.dot_dimension_numbers<[1], [0], [0], [1], [0, 0, 1, 1], [], []>} : vector<8x256xbf16>, vector<256x128xbf16>, vector<8x128xf32> -> vector<8x128xf32>
    %14 = arith.addf %10, %13 : vector<8x128xf32>
    %15 = vector.extract_strided_slice %9 {offsets = [8, 0], sizes = [8, 256], strides = [1, 1]} : vector<64x256xbf16> to vector<8x256xbf16>
    %c256 = arith.constant 256 : index
    %c0_11 = arith.constant 0 : index
    %16 = vector.load %arg4[%c256, %c0_11] : memref<2048x128xbf16, #tpu.memory_space<vmem>>, vector<256x128xbf16>
    %cst_12 = arith.constant dense<0.000000e+00> : vector<8x128xf32>
    %17 = tpu.matmul %15, %16, %cst_12 {dimension_numbers = #tpu.dot_dimension_numbers<[1], [0], [0], [1], [0, 0, 1, 1], [], []>} : vector<8x256xbf16>, vector<256x128xbf16>, vector<8x128xf32> -> vector<8x128xf32>
    %18 = arith.addf %14, %17 : vector<8x128xf32>
    %19 = vector.extract_strided_slice %9 {offsets = [16, 0], sizes = [8, 256], strides = [1, 1]} : vector<64x256xbf16> to vector<8x256xbf16>
    %c512 = arith.constant 512 : index
    %c0_13 = arith.constant 0 : index
    %20 = vector.load %arg4[%c512, %c0_13] : memref<2048x128xbf16, #tpu.memory_space<vmem>>, vector<256x128xbf16>
    %cst_14 = arith.constant dense<0.000000e+00> : vector<8x128xf32>
    %21 = tpu.matmul %19, %20, %cst_14 {dimension_numbers = #tpu.dot_dimension_numbers<[1], [0], [0], [1], [0, 0, 1, 1], [], []>} : vector<8x256xbf16>, vector<256x128xbf16>, vector<8x128xf32> -> vector<8x128xf32>
    %22 = arith.addf %18, %21 : vector<8x128xf32>
    %23 = vector.extract_strided_slice %9 {offsets = [24, 0], sizes = [8, 256], strides = [1, 1]} : vector<64x256xbf16> to vector<8x256xbf16>
    %c768 = arith.constant 768 : index
    %c0_15 = arith.constant 0 : index
    %24 = vector.load %arg4[%c768, %c0_15] : memref<2048x128xbf16, #tpu.memory_space<vmem>>, vector<256x128xbf16>
    %cst_16 = arith.constant dense<0.000000e+00> : vector<8x128xf32>
    %25 = tpu.matmul %23, %24, %cst_16 {dimension_numbers = #tpu.dot_dimension_numbers<[1], [0], [0], [1], [0, 0, 1, 1], [], []>} : vector<8x256xbf16>, vector<256x128xbf16>, vector<8x128xf32> -> vector<8x128xf32>
    %26 = arith.addf %22, %25 : vector<8x128xf32>
    %27 = vector.extract_strided_slice %9 {offsets = [32, 0], sizes = [8, 256], strides = [1, 1]} : vector<64x256xbf16> to vector<8x256xbf16>
    %c1024 = arith.constant 1024 : index
    %c0_17 = arith.constant 0 : index
    %28 = vector.load %arg4[%c1024, %c0_17] : memref<2048x128xbf16, #tpu.memory_space<vmem>>, vector<256x128xbf16>
    %cst_18 = arith.constant dense<0.000000e+00> : vector<8x128xf32>
    %29 = tpu.matmul %27, %28, %cst_18 {dimension_numbers = #tpu.dot_dimension_numbers<[1], [0], [0], [1], [0, 0, 1, 1], [], []>} : vector<8x256xbf16>, vector<256x128xbf16>, vector<8x128xf32> -> vector<8x128xf32>
    %30 = arith.addf %26, %29 : vector<8x128xf32>
    %31 = vector.extract_strided_slice %9 {offsets = [40, 0], sizes = [8, 256], strides = [1, 1]} : vector<64x256xbf16> to vector<8x256xbf16>
    %c1280 = arith.constant 1280 : index
    %c0_19 = arith.constant 0 : index
    %32 = vector.load %arg4[%c1280, %c0_19] : memref<2048x128xbf16, #tpu.memory_space<vmem>>, vector<256x128xbf16>
    %cst_20 = arith.constant dense<0.000000e+00> : vector<8x128xf32>
    %33 = tpu.matmul %31, %32, %cst_20 {dimension_numbers = #tpu.dot_dimension_numbers<[1], [0], [0], [1], [0, 0, 1, 1], [], []>} : vector<8x256xbf16>, vector<256x128xbf16>, vector<8x128xf32> -> vector<8x128xf32>
    %34 = arith.addf %30, %33 : vector<8x128xf32>
    %35 = vector.extract_strided_slice %9 {offsets = [48, 0], sizes = [8, 256], strides = [1, 1]} : vector<64x256xbf16> to vector<8x256xbf16>
    %c1536 = arith.constant 1536 : index
    %c0_21 = arith.constant 0 : index
    %36 = vector.load %arg4[%c1536, %c0_21] : memref<2048x128xbf16, #tpu.memory_space<vmem>>, vector<256x128xbf16>
    %cst_22 = arith.constant dense<0.000000e+00> : vector<8x128xf32>
    %37 = tpu.matmul %35, %36, %cst_22 {dimension_numbers = #tpu.dot_dimension_numbers<[1], [0], [0], [1], [0, 0, 1, 1], [], []>} : vector<8x256xbf16>, vector<256x128xbf16>, vector<8x128xf32> -> vector<8x128xf32>
    %38 = arith.addf %34, %37 : vector<8x128xf32>
    %39 = vector.extract_strided_slice %9 {offsets = [56, 0], sizes = [8, 256], strides = [1, 1]} : vector<64x256xbf16> to vector<8x256xbf16>
    %c1792 = arith.constant 1792 : index
    %c0_23 = arith.constant 0 : index
    %40 = vector.load %arg4[%c1792, %c0_23] : memref<2048x128xbf16, #tpu.memory_space<vmem>>, vector<256x128xbf16>
    %cst_24 = arith.constant dense<0.000000e+00> : vector<8x128xf32>
    %41 = tpu.matmul %39, %40, %cst_24 {dimension_numbers = #tpu.dot_dimension_numbers<[1], [0], [0], [1], [0, 0, 1, 1], [], []>} : vector<8x256xbf16>, vector<256x128xbf16>, vector<8x128xf32> -> vector<8x128xf32>
    %42 = arith.addf %38, %41 : vector<8x128xf32>
    %c0_25 = arith.constant 0 : index
    %c0_26 = arith.constant 0 : index
    %43 = vector.load %arg5[%c0_25, %c0_26] : memref<1x128xf32, #tpu.memory_space<vmem>>, vector<1x128xf32>
    %44 = vector.broadcast %43 : vector<1x128xf32> to vector<8x128xf32>
    %45 = arith.addf %42, %44 : vector<8x128xf32>
    %46 = tpu.iota {dimensions = array<i32: 1>} : vector<8x128xi32>
    %c20_i32 = arith.constant 20 : i32
    %47 = vector.broadcast %c20_i32 : i32 to vector<8x128xi32>
    %48 = arith.cmpi slt, %46, %47 : vector<8x128xi32>
    %c20_i32_27 = arith.constant 20 : i32
    %49 = vector.broadcast %c20_i32_27 : i32 to vector<8x128xi32>
    %50 = arith.cmpi sge, %46, %49 : vector<8x128xi32>
    %c40_i32 = arith.constant 40 : i32
    %51 = vector.broadcast %c40_i32 : i32 to vector<8x128xi32>
    %52 = arith.cmpi slt, %46, %51 : vector<8x128xi32>
    %53 = arith.andi %50, %52 : vector<8x128xi1>
    %cst_28 = arith.constant -1.000000e+30 : f32
    %54 = vector.broadcast %cst_28 : f32 to vector<8x128xf32>
    %55 = arith.select %48, %45, %54 : vector<8x128xi1>, vector<8x128xf32>
    %cst_29 = arith.constant dense<0xFF800000> : vector<8xf32>
    %56 = vector.multi_reduction <maximumf>, %55, %cst_29 [1] : vector<8x128xf32> to vector<8xf32>
    %57 = vector.shape_cast %56 : vector<8xf32> to vector<8x1xf32>
    %58 = vector.broadcast %57 : vector<8x1xf32> to vector<8x128xf32>
    %59 = arith.subf %55, %58 : vector<8x128xf32>
    %60 = math.exp %59 : vector<8x128xf32>
    %cst_30 = arith.constant 0.000000e+00 : f32
    %61 = vector.broadcast %cst_30 : f32 to vector<8x128xf32>
    %62 = arith.select %48, %60, %61 : vector<8x128xi1>, vector<8x128xf32>
    %cst_31 = arith.constant dense<0.000000e+00> : vector<8xf32>
    %63 = vector.multi_reduction <add>, %62, %cst_31 [1] : vector<8x128xf32> to vector<8xf32>
    %64 = vector.shape_cast %63 : vector<8xf32> to vector<8x1xf32>
    %65 = vector.broadcast %64 : vector<8x1xf32> to vector<8x128xf32>
    %66 = arith.divf %62, %65 : vector<8x128xf32>
    %cst_32 = arith.constant -1.000000e+30 : f32
    %67 = vector.broadcast %cst_32 : f32 to vector<8x128xf32>
    %68 = arith.select %53, %45, %67 : vector<8x128xi1>, vector<8x128xf32>
    %cst_33 = arith.constant dense<0xFF800000> : vector<8xf32>
    %69 = vector.multi_reduction <maximumf>, %68, %cst_33 [1] : vector<8x128xf32> to vector<8xf32>
    %70 = vector.shape_cast %69 : vector<8xf32> to vector<8x1xf32>
    %71 = vector.broadcast %70 : vector<8x1xf32> to vector<8x128xf32>
    %72 = arith.subf %68, %71 : vector<8x128xf32>
    %73 = math.exp %72 : vector<8x128xf32>
    %cst_34 = arith.constant 0.000000e+00 : f32
    %74 = vector.broadcast %cst_34 : f32 to vector<8x128xf32>
    %75 = arith.select %53, %73, %74 : vector<8x128xi1>, vector<8x128xf32>
    %cst_35 = arith.constant dense<0.000000e+00> : vector<8xf32>
    %76 = vector.multi_reduction <add>, %75, %cst_35 [1] : vector<8x128xf32> to vector<8xf32>
    %77 = vector.shape_cast %76 : vector<8xf32> to vector<8x1xf32>
    %78 = vector.broadcast %77 : vector<8x1xf32> to vector<8x128xf32>
    %79 = arith.divf %75, %78 : vector<8x128xf32>
    %cst_36 = arith.constant dense<0xFF800000> : vector<8xf32>
    %80 = vector.multi_reduction <maximumf>, %66, %cst_36 [1] : vector<8x128xf32> to vector<8xf32>
    %81 = vector.shape_cast %80 : vector<8xf32> to vector<8x1xf32>
    %cst_37 = arith.constant 1.000000e+00 : f32
    %82 = vector.broadcast %cst_37 : f32 to vector<8x128xf32>
    %83 = arith.select %53, %79, %82 : vector<8x128xi1>, vector<8x128xf32>
    %cst_38 = arith.constant dense<0x7F800000> : vector<8xf32>
    %84 = vector.multi_reduction <minimumf>, %83, %cst_38 [1] : vector<8x128xf32> to vector<8xf32>
    %85 = vector.shape_cast %84 : vector<8xf32> to vector<8x1xf32>
    %cst_39 = arith.constant 3.100000e-01 : f32
    %86 = vector.broadcast %cst_39 : f32 to vector<8x1xf32>
    %87 = arith.addf %85, %86 : vector<8x1xf32>
    %88 = arith.cmpf oge, %81, %87 : vector<8x1xf32>
    %cst_40 = arith.constant 0.000000e+00 : f32
    %89 = vector.shape_cast %88 : vector<8x1xi1> to vector<8x1xi1>
    %90 = vector.broadcast %89 : vector<8x1xi1> to vector<8x128xi1>
    %91 = vector.broadcast %cst_40 : f32 to vector<8x128xf32>
    %92 = arith.select %90, %66, %91 : vector<8x128xi1>, vector<8x128xf32>
    %c0_41 = arith.constant 0 : index
    %c0_42 = arith.constant 0 : index
    %93 = vector.load %arg6[%c0_41, %c0_42] : memref<8x128xf32, #tpu.memory_space<vmem>>, vector<8x128xf32>
    tpu.vector_store %arg6[%c0_41, %c0_42], %92 {strides = array<i32>} : memref<8x128xf32, #tpu.memory_space<vmem>>, vector<8x128xf32>,
    return
  }
  func.func @transform_0(%arg0: i32) -> (i32, i32, i32) {
    %c0_i32 = arith.constant 0 : i32
    %c0_i32_0 = arith.constant 0 : i32
    %c0_i32_1 = arith.constant 0 : i32
    return %c0_i32, %arg0, %c0_i32_0 : i32, i32, i32
  }
  func.func @transform_1(%arg0: i32) -> (i32, i32) {
    %c0_i32 = arith.constant 0 : i32
    %c0_i32_0 = arith.constant 0 : i32
    %c0_i32_1 = arith.constant 0 : i32
    return %c0_i32, %c0_i32_0 : i32, i32
  }
  func.func @transform_2(%arg0: i32) -> (i32, i32) {
    %c0_i32 = arith.constant 0 : i32
    %c0_i32_0 = arith.constant 0 : i32
    %c0_i32_1 = arith.constant 0 : i32
    return %c0_i32, %c0_i32_0 : i32, i32
  }
  func.func @transform_3(%arg0: i32) -> (i32, i32) {
    %c0_i32 = arith.constant 0 : i32
    %c0_i32_0 = arith.constant 0 : i32
    %c0_i32_1 = arith.constant 0 : i32
    return %c0_i32, %c0_i32_0 : i32, i32
  }
  func.func @transform_4(%arg0: i32) -> (i32, i32) {
    %c0_i32 = arith.constant 0 : i32
    %c0_i32_0 = arith.constant 0 : i32
    %c0_i32_1 = arith.constant 0 : i32
    return %c0_i32, %c0_i32_0 : i32, i32
  }
  func.func @transform_5(%arg0: i32) -> (i32, i32) {
    %c0_i32 = arith.constant 0 : i32
    %c0_i32_0 = arith.constant 0 : i32
    return %arg0, %c0_i32 : i32, i32
  }
}

</mosaic_0001>

<bundles_post_ra>
// kernel: hybrid_forward.1
= control target key start
LH: loop header
LB: loop body
LE: loop exit
PB: predicated region body
PF: predicated region fallthrough
CT: control target
= control target key end

     0   :  { %s2920_s1 = inlined_call_operand.vmem [shape: bf16[128,256], index: 1, kind: input, shape index: {}]   ;;  %s2921_s0 = inlined_call_operand.vmem [shape: bf16[8,8,128], index: 0, kind: input, shape index: {}]   ;;  %s2922_s3 = inlined_call_operand.vmem [shape: bf16[2048,128], index: 3, kind: input, shape index: {}]   ;;  %s2923_s2 = inlined_call_operand.vmem [shape: f32[1,256], index: 2, kind: input, shape index: {}]   ;;  %s2924_s4 = inlined_call_operand.vmem [shape: f32[1,128], index: 4, kind: input, shape index: {}]   ;;  %s2925_s5 = inlined_call_operand.vmem [shape: f32[8,128], index: 5, kind: output, shape index: {}]  }
   0x1   :  { %v1678_v0 = vld [vmem:[%s2920_s1 + $0x70] sm:$0xf]  ;;  %v2215_v1 = vld [vmem:[%s2920_s1 + $0x74] sm:$0xf0]  ;;  %v2214_v2 = vld [vmem:[%s2920_s1 + $0x74] sm:$0xf] }
   0x2   :  { %v1679_v3 = vor.u32 %v2215_v1, %v1678_v0  ;;  %v1680_v4 = vld [vmem:[%s2920_s1 + $0x78] sm:$0xf0]  ;;  %v1670_v5 = vld [vmem:[%s2920_s1 + $0x60] sm:$0xf]  ;;  %v2213_v6 = vld [vmem:[%s2920_s1 + $0x64] sm:$0xf0] }
   0x3   :  { %v1683_v7 = vor.u32 %v2214_v2, %v1680_v4  ;;  %v2212_v8 = vld [vmem:[%s2920_s1 + $0x64] sm:$0xf]  ;;  %v1672_v9 = vld [vmem:[%s2920_s1 + $0x68] sm:$0xf0]  ;;  %v1671_v10 = vor.u32 %v2213_v6, %v1670_v5  ;;  %v1662_v12 = vld [vmem:[%s2920_s1 + $0x50] sm:$0xf] }
   0x4   :  { %154 = vmatpush.bf16.msra.mxu0 %v1679_v3  ;;  %v1675_v11 = vor.u32 %v2212_v8, %v1672_v9  ;;  %v2211_v13 = vld [vmem:[%s2920_s1 + $0x54] sm:$0xf0]  ;;  %v2210_v14 = vld [vmem:[%s2920_s1 + $0x54] sm:$0xf]  ;;  %v1664_v15 = vld [vmem:[%s2920_s1 + $0x58] sm:$0xf0] }
   0x5   :  { %183 = vmatpush.bf16.msra.mxu1 %v1683_v7  ;;  %v1663_v16 = vor.u32 %v2211_v13, %v1662_v12  ;;  %v1667_v17 = vor.u32 %v2210_v14, %v1664_v15  ;;  %v1654_v18 = vld [vmem:[%s2920_s1 + $0x40] sm:$0xf]  ;;  %v2209_v19 = vld [vmem:[%s2920_s1 + $0x44] sm:$0xf0]  ;;  %v2208_v20 = vld [vmem:[%s2920_s1 + $0x44] sm:$0xf] }
   0x6   :  { %v1656_v21 = vld [vmem:[%s2920_s1 + $0x48] sm:$0xf0]  ;;  %v1655_v22 = vor.u32 %v2209_v19, %v1654_v18  ;;  %v1646_v24 = vld [vmem:[%s2920_s1 + $0x30] sm:$0xf]  ;;  %v2207_v25 = vld [vmem:[%s2920_s1 + $0x34] sm:$0xf0] }
   0x7   :  { %v1659_v23 = vor.u32 %v2208_v20, %v1656_v21  ;;  %v2206_v26 = vld [vmem:[%s2920_s1 + $0x34] sm:$0xf]  ;;  %v1648_v27 = vld [vmem:[%s2920_s1 + $0x38] sm:$0xf0]  ;;  %v1647_v28 = vor.u32 %v2207_v25, %v1646_v24  ;;  %v1638_v30 = vld [vmem:[%s2920_s1 + $0x20] sm:$0xf] }
   0x8   :  { %155 = vmatpush.bf16.msra.mxu0 %v1671_v10  ;;  %v1651_v29 = vor.u32 %v2206_v26, %v1648_v27  ;;  %v2205_v31 = vld [vmem:[%s2920_s1 + $0x24] sm:$0xf0]  ;;  %v2204_v32 = vld [vmem:[%s2920_s1 + $0x24] sm:$0xf]  ;;  %v1640_v33 = vld [vmem:[%s2920_s1 + $0x28] sm:$0xf0] }
   0x9   :  { %184 = vmatpush.bf16.msra.mxu1 %v1675_v11  ;;  %v1639_v34 = vor.u32 %v2205_v31, %v1638_v30  ;;  %v1643_v35 = vor.u32 %v2204_v32, %v1640_v33  ;;  %v1630_v36 = vld [vmem:[%s2920_s1 + $0x10] sm:$0xf]  ;;  %v2203_v37 = vld [vmem:[%s2920_s1 + $0x14] sm:$0xf0]  ;;  %v2202_v38 = vld [vmem:[%s2920_s1 + $0x14] sm:$0xf] }
   0xa   :  { %v1632_v39 = vld [vmem:[%s2920_s1 + $0x18] sm:$0xf0]  ;;  %v1631_v40 = vor.u32 %v2203_v37, %v1630_v36  ;;  %v1622_v42 = vld [vmem:[%s2920_s1] sm:$0xf]  ;;  %v2201_v43 = vld [vmem:[%s2920_s1 + $0x4] sm:$0xf0] }
   0xb   :  { %v1635_v41 = vor.u32 %v2202_v38, %v1632_v39  ;;  %v2200_v44 = vld [vmem:[%s2920_s1 + $0x4] sm:$0xf]  ;;  %v1624_v45 = vld [vmem:[%s2920_s1 + $0x8] sm:$0xf0]  ;;  %v1623_v46 = vor.u32 %v2201_v43, %v1622_v42  ;;  %v2239_v50 = vld [vmem:[%s2922_s3 + $0xb8] sm:$0xff] }
   0xc   :  { %156 = vmatpush.bf16.msra.mxu0 %v1663_v16  ;;  %v1627_v47 = vor.u32 %v2200_v44, %v1624_v45  ;;  %v2196_v48 = vld [vmem:[%s2921_s0] sm:$0xff]  ;;  %v2197_v49 = vld [vmem:[%s2921_s0 + $0x8] sm:$0xff]  ;;  %v2247_v51 = vld [vmem:[%s2922_s3 + $0xf8] sm:$0xff]  ;;  %403 = vmatpush.bf16.msra.mxu2 %v2239_v50 }
   0xd   :  { %185 = vmatpush.bf16.msra.mxu1 %v1667_v17  ;;  %416 = vmatpush.bf16.msra.mxu3 %v2247_v51  ;;  %v2238_v52 = vld [vmem:[%s2922_s3 + $0xb0] sm:$0xff]  ;;  %v2237_v54 = vld [vmem:[%s2922_s3 + $0xa8] sm:$0xff]  ;;  %v2255_v56 = vld [vmem:[%s2922_s3 + $0x138] sm:$0xff] }
   0xe   :  { %v2246_v53 = vld [vmem:[%s2922_s3 + $0xf0] sm:$0xff]  ;;  %v2245_v55 = vld [vmem:[%s2922_s3 + $0xe8] sm:$0xff]  ;;  %v2263_v57 = vld [vmem:[%s2922_s3 + $0x178] sm:$0xff] }
   0xf   :  { %v2236_v58 = vld [vmem:[%s2922_s3 + $0xa0] sm:$0xff]  ;;  %v2198_v60 = vld [vmem:[%s2921_s0 + $0x10] sm:$0xff]  ;;  %v2235_v61 = vld [vmem:[%s2922_s3 + $0x98] sm:$0xff] }
  0x10   :  { %157 = vmatpush.bf16.msra.mxu0 %v1655_v22  ;;  %404 = vmatpush.bf16.msra.mxu2 %v2238_v52  ;;  %v2244_v59 = vld [vmem:[%s2922_s3 + $0xe0] sm:$0xff]  ;;  %v2243_v62 = vld [vmem:[%s2922_s3 + $0xd8] sm:$0xff]  ;;  %v2234_v63 = vld [vmem:[%s2922_s3 + $0x90] sm:$0xff] }
  0x11   :  { %186 = vmatpush.bf16.msra.mxu1 %v1659_v23  ;;  %417 = vmatpush.bf16.msra.mxu3 %v2246_v53  ;;  %v2242_v0 = vld [vmem:[%s2922_s3 + $0xd0] sm:$0xff]  ;;  %v2233_v1 = vld [vmem:[%s2922_s3 + $0x88] sm:$0xff]  ;;  %v2232_v3 = vld [vmem:[%s2922_s3 + $0x80] sm:$0xff] }
  0x12   :  { %v2241_v2 = vld [vmem:[%s2922_s3 + $0xc8] sm:$0xff]  ;;  %v2240_v4 = vld [vmem:[%s2922_s3 + $0xc0] sm:$0xff]  ;;  %v2199_v5 = vld [vmem:[%s2921_s0 + $0x18] sm:$0xff] }
  0x13   :  { %v2223_v6 = vld [vmem:[%s2922_s3 + $0x38] sm:$0xff]  ;;  %v2222_v8 = vld [vmem:[%s2922_s3 + $0x30] sm:$0xff]  ;;  %v2221_v10 = vld [vmem:[%s2922_s3 + $0x28] sm:$0xff] }
  0x14   :  { %158 = vmatpush.bf16.msra.mxu0 %v1647_v28  ;;  %405 = vmatpush.bf16.msra.mxu2 %v2237_v54  ;;  %v2231_v7 = vld [vmem:[%s2922_s3 + $0x78] sm:$0xff]  ;;  %v2230_v9 = vld [vmem:[%s2922_s3 + $0x70] sm:$0xff]  ;;  %v2229_v11 = vld [vmem:[%s2922_s3 + $0x68] sm:$0xff] }
  0x15   :  { %187 = vmatpush.bf16.msra.mxu1 %v1651_v29  ;;  %418 = vmatpush.bf16.msra.mxu3 %v2245_v55  ;;  %v2220_v12 = vld [vmem:[%s2922_s3 + $0x20] sm:$0xff]  ;;  %v2254_v14 = vld [vmem:[%s2922_s3 + $0x130] sm:$0xff]  ;;  %v2219_v16 = vld [vmem:[%s2922_s3 + $0x18] sm:$0xff] }
  0x16   :  { %v2228_v13 = vld [vmem:[%s2922_s3 + $0x60] sm:$0xff]  ;;  %v2262_v15 = vld [vmem:[%s2922_s3 + $0x170] sm:$0xff]  ;;  %v2227_v17 = vld [vmem:[%s2922_s3 + $0x58] sm:$0xff] }
  0x17   :  { %v2253_v18 = vld [vmem:[%s2922_s3 + $0x128] sm:$0xff]  ;;  %v2218_v20 = vld [vmem:[%s2922_s3 + $0x10] sm:$0xff]  ;;  %v2252_v22 = vld [vmem:[%s2922_s3 + $0x120] sm:$0xff] }
  0x18   :  { %159 = vmatpush.bf16.msra.mxu0 %v1639_v34  ;;  %406 = vmatpush.bf16.msra.mxu2 %v2236_v58  ;;  %v2261_v19 = vld [vmem:[%s2922_s3 + $0x168] sm:$0xff]  ;;  %v2226_v21 = vld [vmem:[%s2922_s3 + $0x50] sm:$0xff]  ;;  %v2260_v23 = vld [vmem:[%s2922_s3 + $0x160] sm:$0xff] }
  0x19   :  { %188 = vmatpush.bf16.msra.mxu1 %v1643_v35  ;;  %419 = vmatpush.bf16.msra.mxu3 %v2244_v59  ;;  %v2217_v24 = vld [vmem:[%s2922_s3 + $0x8] sm:$0xff]  ;;  %v2251_v26 = vld [vmem:[%s2922_s3 + $0x118] sm:$0xff]  ;;  %v2216_v28 = vld [vmem:[%s2922_s3] sm:$0xff] }
  0x1a   :  { %v2225_v25 = vld [vmem:[%s2922_s3 + $0x48] sm:$0xff]  ;;  %v2259_v27 = vld [vmem:[%s2922_s3 + $0x158] sm:$0xff]  ;;  %v2224_v29 = vld [vmem:[%s2922_s3 + $0x40] sm:$0xff] }
  0x1b   :  { %v2250_v30 = vld [vmem:[%s2922_s3 + $0x110] sm:$0xff]  ;;  %v2249_v32 = vld [vmem:[%s2922_s3 + $0x108] sm:$0xff]  ;;  %v2248_v34 = vld [vmem:[%s2922_s3 + $0x100] sm:$0xff] }
  0x1c   :  { %160 = vmatpush.bf16.msra.mxu0 %v1631_v40  ;;  %407 = vmatpush.bf16.msra.mxu2 %v2235_v61  ;;  %v2258_v31 = vld [vmem:[%s2922_s3 + $0x150] sm:$0xff]  ;;  %v2257_v33 = vld [vmem:[%s2922_s3 + $0x148] sm:$0xff]  ;;  %v2256_v35 = vld [vmem:[%s2922_s3 + $0x140] sm:$0xff] }
  0x1d   :  { %189 = vmatpush.bf16.msra.mxu1 %v1635_v41  ;;  %420 = vmatpush.bf16.msra.mxu3 %v2243_v62  ;;  %v2287_v36 = vld [vmem:[%s2922_s3 + $0x238] sm:$0xff]  ;;  %v2286_v38 = vld [vmem:[%s2922_s3 + $0x230] sm:$0xff]  ;;  %v2285_v42 = vld [vmem:[%s2922_s3 + $0x228] sm:$0xff] }
  0x1e   :  { %v2295_v37 = vld [vmem:[%s2922_s3 + $0x278] sm:$0xff]  ;;  %v2294_v39 = vld [vmem:[%s2922_s3 + $0x270] sm:$0xff]  ;;  %v44_v43 = vld [vmem:[%s2923_s2] sm:$0x3] }
  0x1f   :  { %v2293_v44 = vld [vmem:[%s2922_s3 + $0x268] sm:$0xff]  ;;  %v2656_v45 = vperm.slane %v44_v43, 0  ;;  %v2283_v54 = vld [vmem:[%s2922_s3 + $0x218] sm:$0xff]  ;;  %v2282_v58 = vld [vmem:[%s2922_s3 + $0x210] sm:$0xff] }
  0x20   :  { %161 = vmatpush.bf16.msra.mxu0 %v1623_v46  ;;  %408 = vmatpush.bf16.msra.mxu2 %v2234_v63  ;;  %v2284_v46 = vld [vmem:[%s2922_s3 + $0x220] sm:$0xff]  ;;  %v2291_v55 = vld [vmem:[%s2922_s3 + $0x258] sm:$0xff]  ;;  %v2290_v59 = vld [vmem:[%s2922_s3 + $0x250] sm:$0xff] }
  0x21   :  { %190 = vmatpush.bf16.msra.mxu1 %v1627_v47  ;;  %421 = vmatpush.bf16.msra.mxu3 %v2242_v0  ;;  %v2292_v47 = vld [vmem:[%s2922_s3 + $0x260] sm:$0xff]  ;;  %v2271_v0 = vld [vmem:[%s2922_s3 + $0x1b8] sm:$0xff] }
  0x23   :  { %162 = vmatmul.bf16.vlgmr.msra.gmra.mxu0 %v2196_v48 }
  0x24   :  { %191 = vmatmul.bf16.vlgmr.msra.gmra.mxu1 %v2196_v48  ;;  %693 = vmatpush.bf16.msrb.mxu0 %v2255_v56  ;;  %v2664_v48 = vperm.slane %v44_v43, 1 }
  0x25   :  { %706 = vmatpush.bf16.msrb.mxu1 %v2263_v57  ;;  %409 = vmatpush.bf16.msra.mxu2 %v2233_v1  ;;  %v2279_v1 = vld [vmem:[%s2922_s3 + $0x1f8] sm:$0xff] }
  0x26   :  { %422 = vmatpush.bf16.msra.mxu3 %v2241_v2 }
  0x28   :  { %694 = vmatpush.bf16.msrb.mxu0 %v2254_v14 }
  0x29   :  { %410 = vmatpush.bf16.msra.mxu2 %v2232_v3  ;;  %707 = vmatpush.bf16.msrb.mxu1 %v2262_v15 }
  0x2a   :  { %423 = vmatpush.bf16.msra.mxu3 %v2240_v4 }
  0x2c   :  { %695 = vmatpush.bf16.msrb.mxu0 %v2253_v18  ;;  %v2288_v18 = vld [vmem:[%s2922_s3 + $0x240] sm:$0xff] }
  0x2d   :  { %532 = vmatpush.bf16.msrb.mxu2 %v2223_v6  ;;  %708 = vmatpush.bf16.msrb.mxu1 %v2261_v19 }
  0x2e   :  { %545 = vmatpush.bf16.msrb.mxu3 %v2231_v7 }
  0x30   :  { %696 = vmatpush.bf16.msrb.mxu0 %v2252_v22  ;;  %v2269_v22 = vld [vmem:[%s2922_s3 + $0x1a8] sm:$0xff] }
  0x31   :  { %533 = vmatpush.bf16.msrb.mxu2 %v2222_v8  ;;  %709 = vmatpush.bf16.msrb.mxu1 %v2260_v23  ;;  %v2277_v23 = vld [vmem:[%s2922_s3 + $0x1e8] sm:$0xff] }
  0x32   :  { %546 = vmatpush.bf16.msrb.mxu3 %v2230_v9  ;;  %v2281_v9 = vld [vmem:[%s2922_s3 + $0x208] sm:$0xff] }
  0x33   :  { %167 = vmatmul.bf16.gmra.mxu0 %v2197_v49 }
  0x34   :  { %196 = vmatmul.bf16.gmra.mxu1 %v2197_v49  ;;  %697 = vmatpush.bf16.msrb.mxu0 %v2251_v26 }
  0x35   :  { %534 = vmatpush.bf16.msrb.mxu2 %v2221_v10  ;;  %710 = vmatpush.bf16.msrb.mxu1 %v2259_v27  ;;  %v2289_v10 = vld [vmem:[%s2922_s3 + $0x248] sm:$0xff] }
  0x36   :  { %547 = vmatpush.bf16.msrb.mxu3 %v2229_v11 }
  0x38   :  { %698 = vmatpush.bf16.msrb.mxu0 %v2250_v30  ;;  %v2268_v30 = vld [vmem:[%s2922_s3 + $0x1a0] sm:$0xff] }
  0x39   :  { %535 = vmatpush.bf16.msrb.mxu2 %v2220_v12  ;;  %711 = vmatpush.bf16.msrb.mxu1 %v2258_v31  ;;  %v2270_v12 = vld [vmem:[%s2922_s3 + $0x1b0] sm:$0xff]  ;;  %v2276_v31 = vld [vmem:[%s2922_s3 + $0x1e0] sm:$0xff] }
  0x3a   :  { %548 = vmatpush.bf16.msrb.mxu3 %v2228_v13  ;;  %v2278_v13 = vld [vmem:[%s2922_s3 + $0x1f0] sm:$0xff] }
  0x3c   :  { %699 = vmatpush.bf16.msrb.mxu0 %v2249_v32 }
  0x3d   :  { %536 = vmatpush.bf16.msrb.mxu2 %v2219_v16  ;;  %712 = vmatpush.bf16.msrb.mxu1 %v2257_v33 }
  0x3e   :  { %549 = vmatpush.bf16.msrb.mxu3 %v2227_v17  ;;  %v2280_v17 = vld [vmem:[%s2922_s3 + $0x200] sm:$0xff] }
  0x40   :  { %700 = vmatpush.bf16.msrb.mxu0 %v2248_v34  ;;  %v2318_v34 = vld [vmem:[%s2922_s3 + $0x330] sm:$0xff] }
  0x41   :  { %537 = vmatpush.bf16.msrb.mxu2 %v2218_v20  ;;  %713 = vmatpush.bf16.msrb.mxu1 %v2256_v35  ;;  %v2326_v35 = vld [vmem:[%s2922_s3 + $0x370] sm:$0xff] }
  0x42   :  { %550 = vmatpush.bf16.msrb.mxu3 %v2226_v21 }
  0x43   :  { %172 = vmatmul.bf16.gmra.mxu0 %v2198_v60 }
  0x44   :  { %201 = vmatmul.bf16.gmra.mxu1 %v2198_v60  ;;  %1017 = vmatpush.bf16.msra.mxu0 %v2287_v36 }
  0x45   :  { %538 = vmatpush.bf16.msrb.mxu2 %v2217_v24  ;;  %1030 = vmatpush.bf16.msra.mxu1 %v2295_v37 }
  0x46   :  { %551 = vmatpush.bf16.msrb.mxu3 %v2225_v25 }
  0x48   :  { %1018 = vmatpush.bf16.msra.mxu0 %v2286_v38 }
  0x49   :  { %539 = vmatpush.bf16.msrb.mxu2 %v2216_v28  ;;  %1031 = vmatpush.bf16.msra.mxu1 %v2294_v39  ;;  %v2319_v28 = vld [vmem:[%s2922_s3 + $0x338] sm:$0xff] }
  0x4a   :  { %552 = vmatpush.bf16.msrb.mxu3 %v2224_v29  ;;  %v2327_v29 = vld [vmem:[%s2922_s3 + $0x378] sm:$0xff] }
  0x4b   :  { %v2267_v39 = vld [vmem:[%s2922_s3 + $0x198] sm:$0xff] }
  0x4c   :  { %1019 = vmatpush.bf16.msra.mxu0 %v2285_v42 }
  0x4d   :  { %1032 = vmatpush.bf16.msra.mxu1 %v2293_v44 }
  0x50   :  { %1020 = vmatpush.bf16.msra.mxu0 %v2284_v46 }
  0x51   :  { %1033 = vmatpush.bf16.msra.mxu1 %v2292_v47  ;;  %v2317_v47 = vld [vmem:[%s2922_s3 + $0x328] sm:$0xff] }
  0x53   :  { %177 = vmatmul.bf16.gmra.mxu0 %v2199_v5 }
  0x54   :  { %206 = vmatmul.bf16.gmra.mxu1 %v2199_v5  ;;  %1021 = vmatpush.bf16.msra.mxu0 %v2283_v54  ;;  %v2266_v54 = vld [vmem:[%s2922_s3 + $0x190] sm:$0xff] }
  0x55   :  { %1034 = vmatpush.bf16.msra.mxu1 %v2291_v55  ;;  %v2274_v55 = vld [vmem:[%s2922_s3 + $0x1d0] sm:$0xff] }
  0x58   :  { %1022 = vmatpush.bf16.msra.mxu0 %v2282_v58  ;;  %v2324_v58 = vld [vmem:[%s2922_s3 + $0x360] sm:$0xff] }
  0x59   :  { %1035 = vmatpush.bf16.msra.mxu1 %v2290_v59 }
  0x5c   :  { %1023 = vmatpush.bf16.msra.mxu0 %v2281_v9  ;;  %v2272_v9 = vld [vmem:[%s2922_s3 + $0x1c0] sm:$0xff] }
  0x5d   :  { %1036 = vmatpush.bf16.msra.mxu1 %v2289_v10  ;;  %v2303_v10 = vld [vmem:[%s2922_s3 + $0x2b8] sm:$0xff] }
  0x60   :  { %1024 = vmatpush.bf16.msra.mxu0 %v2280_v17 }
  0x61   :  { %1037 = vmatpush.bf16.msra.mxu1 %v2288_v18 }
  0xa0   :  { %v163_v40 = vpop.f32.mrf.mxu0 }
  0xa1   :  { %v192_v41 = vpop.f32.mrf.mxu1  ;;  %v164_v63 = vadd.f32 %v163_v40, %v2656_v45  ;;  %v2275_v40 = vld [vmem:[%s2922_s3 + $0x1d8] sm:$0xff] }
  0xa2   :  { %v193_v4 = vadd.f32 %v192_v41, %v2664_v48 }
  0xa3   :  { %v212_v14 = vmax.f32 %v164_v63, 0.0  ;;  %v2265_v63 = vld [vmem:[%s2922_s3 + $0x188] sm:$0xff] }
  0xa4   :  { %v213_v15 = vmax.f32 %v193_v4, 0.0  ;;  %v2315_v4 = vld [vmem:[%s2922_s3 + $0x318] sm:$0xff] }
  0xa6   :  { %v228_v25 = vpack.c.bf16 %v213_v15, %v212_v14 }
  0xa8   :  { %v165_v49 = vpop.f32.mrf.mxu0  ;;  %v430_v32 = vunpack.c.l.b16 %v228_v25  ;;  %v431_v33 = vunpack.c.h.b16 %v228_v25 }
  0xa9   :  { %v166_v50 = vadd.f32 %v165_v49, %v2656_v45  ;;  %v194_v51 = vpop.f32.mrf.mxu1  ;;  %v2325_v49 = vld [vmem:[%s2922_s3 + $0x368] sm:$0xff] }
  0xaa   :  { %v195_v52 = vadd.f32 %v194_v51, %v2664_v48  ;;  %v432_v43 = vpack.c.b16 %v430_v32, %v430_v32  ;;  %v433_v44 = vpack.c.b16 %v431_v33, %v431_v33 }
  0xab   :  { %v214_v53 = vmax.f32 %v166_v50, 0.0 }
  0xac   :  { %v215_v56 = vmax.f32 %v195_v52, 0.0 }
  0xae   :  { %v229_v57 = vpack.c.bf16 %v215_v56, %v214_v53 }
  0xb0   :  { %v301_v60 = vunpack.c.l.b16 %v229_v57  ;;  %v302_v61 = vunpack.c.h.b16 %v229_v57  ;;  %v168_v62 = vpop.f32.mrf.mxu0  ;;  %v2316_v57 = vld [vmem:[%s2922_s3 + $0x320] sm:$0xff] }
  0xb1   :  { %v169_v2 = vadd.f32 %v168_v62, %v2656_v45  ;;  %v197_v3 = vpop.f32.mrf.mxu1 }
  0xb2   :  { %v303_v5 = vpack.c.b16 %v301_v60, %v301_v60  ;;  %v304_v6 = vpack.c.b16 %v302_v61, %v302_v61  ;;  %v198_v7 = vadd.f32 %v197_v3, %v2664_v48 }
  0xb3   :  { %v216_v8 = vmax.f32 %v169_v2, 0.0 }
  0xb4   :  { %411 = vmatmul.bf16.vlgmr.msra.gmra.mxu2 %v303_v5  ;;  %424 = vmatmul.bf16.vlgmr.msra.gmra.mxu3 %v304_v6  ;;  %v217_v11 = vmax.f32 %v198_v7, 0.0  ;;  %v2323_v5 = vld [vmem:[%s2922_s3 + $0x358] sm:$0xff] }
  0xb5   :  { %855 = vmatpush.bf16.msra.mxu2 %v2271_v0  ;;  %868 = vmatpush.bf16.msra.mxu3 %v2279_v1  ;;  %v2273_v0 = vld [vmem:[%s2922_s3 + $0x1c8] sm:$0xff] }
  0xb6   :  { %v230_v16 = vpack.c.bf16 %v217_v11, %v216_v8  ;;  %v2264_v8 = vld [vmem:[%s2922_s3 + $0x180] sm:$0xff]  ;;  %v2311_v11 = vld [vmem:[%s2922_s3 + $0x2f8] sm:$0xff] }
  0xb8   :  { %v170_v19 = vpop.f32.mrf.mxu0  ;;  %v591_v20 = vunpack.c.l.b16 %v230_v16  ;;  %v592_v21 = vunpack.c.h.b16 %v230_v16 }
  0xb9   :  { %856 = vmatpush.bf16.msra.mxu2 %v2270_v12  ;;  %869 = vmatpush.bf16.msra.mxu3 %v2278_v13  ;;  %v199_v24 = vpop.f32.mrf.mxu1  ;;  %v171_v36 = vadd.f32 %v170_v19, %v2656_v45  ;;  %v2314_v12 = vld [vmem:[%s2922_s3 + $0x310] sm:$0xff] }
  0xba   :  { %v593_v26 = vpack.c.b16 %v591_v20, %v591_v20  ;;  %v594_v27 = vpack.c.b16 %v592_v21, %v592_v21  ;;  %v200_v37 = vadd.f32 %v199_v24, %v2664_v48  ;;  %v2322_v13 = vld [vmem:[%s2922_s3 + $0x350] sm:$0xff]  ;;  %v2321_v24 = vld [vmem:[%s2922_s3 + $0x348] sm:$0xff] }
  0xbb   :  { %v218_v51 = vmax.f32 %v171_v36, 0.0  ;;  %v2302_v19 = vld [vmem:[%s2922_s3 + $0x2b0] sm:$0xff]  ;;  %v2300_v36 = vld [vmem:[%s2922_s3 + $0x2a0] sm:$0xff] }
  0xbc   :  { %701 = vmatmul.bf16.vlgmr.msrb.gmra.mxu0 %v593_v26  ;;  %714 = vmatmul.bf16.vlgmr.msrb.gmra.mxu1 %v594_v27  ;;  %v219_v52 = vmax.f32 %v200_v37, 0.0  ;;  %v2310_v20 = vld [vmem:[%s2922_s3 + $0x2f0] sm:$0xff]  ;;  %v2301_v26 = vld [vmem:[%s2922_s3 + $0x2a8] sm:$0xff]  ;;  %v2308_v37 = vld [vmem:[%s2922_s3 + $0x2e0] sm:$0xff] }
  0xbd   :  { %857 = vmatpush.bf16.msra.mxu2 %v2269_v22  ;;  %870 = vmatpush.bf16.msra.mxu3 %v2277_v23  ;;  %v2313_v23 = vld [vmem:[%s2922_s3 + $0x308] sm:$0xff] }
  0xbe   :  { %1341 = vmatpush.bf16.msrb.mxu0 %v2319_v28  ;;  %1354 = vmatpush.bf16.msrb.mxu1 %v2327_v29  ;;  %v231_v59 = vpack.c.bf16 %v219_v52, %v218_v51  ;;  %v2309_v27 = vld [vmem:[%s2922_s3 + $0x2e8] sm:$0xff]  ;;  %v2312_v29 = vld [vmem:[%s2922_s3 + $0x300] sm:$0xff] }
  0xc0   :  { %v173_v38 = vpop.f32.mrf.mxu0  ;;  %v753_v6 = vunpack.c.l.b16 %v231_v59  ;;  %v754_v7 = vunpack.c.h.b16 %v231_v59  ;;  %v2335_v59 = vld [vmem:[%s2922_s3 + $0x3b8] sm:$0xff] }
  0xc1   :  { %858 = vmatpush.bf16.msra.mxu2 %v2268_v30  ;;  %871 = vmatpush.bf16.msra.mxu3 %v2276_v31  ;;  %v174_v41 = vadd.f32 %v173_v38, %v2656_v45  ;;  %v202_v42 = vpop.f32.mrf.mxu1  ;;  %v2320_v30 = vld [vmem:[%s2922_s3 + $0x340] sm:$0xff] }
  0xc2   :  { %v203_v46 = vadd.f32 %v202_v42, %v2664_v48  ;;  %1342 = vmatpush.bf16.msrb.mxu0 %v2318_v34  ;;  %1355 = vmatpush.bf16.msrb.mxu1 %v2326_v35  ;;  %v755_v14 = vpack.c.b16 %v753_v6, %v753_v6  ;;  %v756_v15 = vpack.c.b16 %v754_v7, %v754_v7  ;;  %v2339_v6 = vld [vmem:[%s2922_s3 + $0x3d8] sm:$0xff]  ;;  %v2330_v7 = vld [vmem:[%s2922_s3 + $0x390] sm:$0xff] }
  0xc3   :  { %v220_v50 = vmax.f32 %v174_v41, 0.0 }
  0xc4   :  { %540 = vmatmul.bf16.vlgmr.msrb.gmra.mxu2 %v432_v43  ;;  %553 = vmatmul.bf16.vlgmr.msrb.gmra.mxu3 %v433_v44  ;;  %v221_v53 = vmax.f32 %v203_v46, 0.0  ;;  %v2299_v46 = vld [vmem:[%s2922_s3 + $0x298] sm:$0xff] }
  0xc5   :  { %859 = vmatpush.bf16.msra.mxu2 %v2267_v39  ;;  %872 = vmatpush.bf16.msra.mxu3 %v2275_v40 }
  0xc6   :  { %v232_v56 = vpack.c.bf16 %v221_v53, %v220_v50  ;;  %1343 = vmatpush.bf16.msrb.mxu0 %v2317_v47  ;;  %1356 = vmatpush.bf16.msrb.mxu1 %v2325_v49  ;;  %v2307_v47 = vld [vmem:[%s2922_s3 + $0x2d8] sm:$0xff]  ;;  %v2297_v53 = vld [vmem:[%s2922_s3 + $0x288] sm:$0xff] }
  0xc8   :  { %v915_v60 = vunpack.c.l.b16 %v232_v56  ;;  %v916_v61 = vunpack.c.h.b16 %v232_v56  ;;  %v2760_v62 = vpop.f32.mrf.mxu0 }
  0xc9   :  { %860 = vmatpush.bf16.msra.mxu2 %v2266_v54  ;;  %873 = vmatpush.bf16.msra.mxu3 %v2274_v55  ;;  %v2768_v1 = vpop.f32.mrf.mxu1  ;;  %v176_v43 = vadd.f32 %v2760_v62, %v2656_v45  ;;  %v2305_v54 = vld [vmem:[%s2922_s3 + $0x2c8] sm:$0xff] }
  0xca   :  { %v917_v2 = vpack.c.b16 %v915_v60, %v915_v60  ;;  %v918_v3 = vpack.c.b16 %v916_v61, %v916_v61  ;;  %1344 = vmatpush.bf16.msrb.mxu0 %v2316_v57  ;;  %1357 = vmatpush.bf16.msrb.mxu1 %v2324_v58  ;;  %v205_v44 = vadd.f32 %v2768_v1, %v2664_v48  ;;  %v2296_v57 = vld [vmem:[%s2922_s3 + $0x280] sm:$0xff]  ;;  %v2343_v60 = vld [vmem:[%s2922_s3 + $0x3f8] sm:$0xff]  ;;  %v2333_v1 = vld [vmem:[%s2922_s3 + $0x3a8] sm:$0xff] }
  0xcb   :  { %v222_v50 = vmax.f32 %v176_v43, 0.0  ;;  %v2304_v58 = vld [vmem:[%s2922_s3 + $0x2c0] sm:$0xff] }
  0xcc   :  { %1025 = vmatmul.bf16.vlgmr.msra.gmra.mxu0 %v917_v2  ;;  %1038 = vmatmul.bf16.vlgmr.msra.gmra.mxu1 %v918_v3  ;;  %v223_v51 = vmax.f32 %v205_v44, 0.0  ;;  %v2341_v2 = vld [vmem:[%s2922_s3 + $0x3e8] sm:$0xff]  ;;  %v2332_v3 = vld [vmem:[%s2922_s3 + $0x3a0] sm:$0xff] }
  0xcd   :  { %861 = vmatpush.bf16.msra.mxu2 %v2265_v63  ;;  %874 = vmatpush.bf16.msra.mxu3 %v2273_v0  ;;  %v2334_v63 = vld [vmem:[%s2922_s3 + $0x3b0] sm:$0xff] }
  0xce   :  { %1345 = vmatpush.bf16.msrb.mxu0 %v2315_v4  ;;  %1358 = vmatpush.bf16.msrb.mxu1 %v2323_v5  ;;  %v233_v52 = vpack.c.bf16 %v223_v51, %v222_v50  ;;  %v2342_v0 = vld [vmem:[%s2922_s3 + $0x3f0] sm:$0xff]  ;;  %v2340_v4 = vld [vmem:[%s2922_s3 + $0x3e0] sm:$0xff]  ;;  %v2331_v5 = vld [vmem:[%s2922_s3 + $0x398] sm:$0xff] }
  0xd0   :  { %v178_v16 = vpop.f32.mrf.mxu0  ;;  %v1077_v55 = vunpack.c.l.b16 %v233_v52  ;;  %v1078_v56 = vunpack.c.h.b16 %v233_v52 }
  0xd1   :  { %862 = vmatpush.bf16.msra.mxu2 %v2264_v8  ;;  %875 = vmatpush.bf16.msra.mxu3 %v2272_v9  ;;  %v179_v17 = vadd.f32 %v178_v16, %v2656_v45  ;;  %v207_v18 = vpop.f32.mrf.mxu1  ;;  %v2338_v8 = vld [vmem:[%s2922_s3 + $0x3d0] sm:$0xff]  ;;  %v2329_v9 = vld [vmem:[%s2922_s3 + $0x388] sm:$0xff] }
  0xd2   :  { %v208_v21 = vadd.f32 %v207_v18, %v2664_v48  ;;  %1346 = vmatpush.bf16.msrb.mxu0 %v2314_v12  ;;  %1359 = vmatpush.bf16.msrb.mxu1 %v2322_v13  ;;  %v1079_v61 = vpack.c.b16 %v1077_v55, %v1077_v55  ;;  %v1080_v62 = vpack.c.b16 %v1078_v56, %v1078_v56  ;;  %v2336_v12 = vld [vmem:[%s2922_s3 + $0x3c0] sm:$0xff]  ;;  %v1535_v55 = vlaneseq }
  0xd3   :  { %v224_v22 = vmax.f32 %v179_v17, 0.0 }
  0xd4   :  { %863 = vmatmul.bf16.vlgmr.msra.gmra.mxu2 %v755_v14  ;;  %876 = vmatmul.bf16.vlgmr.msra.gmra.mxu3 %v756_v15  ;;  %v225_v25 = vmax.f32 %v208_v21, 0.0 }
  0xd5   :  { %1179 = vmatpush.bf16.msrb.mxu2 %v2303_v10  ;;  %1192 = vmatpush.bf16.msrb.mxu3 %v2311_v11  ;;  %v2337_v10 = vld [vmem:[%s2922_s3 + $0x3c8] sm:$0xff]  ;;  %v2328_v11 = vld [vmem:[%s2922_s3 + $0x380] sm:$0xff] }
  0xd6   :  { %v234_v28 = vpack.c.bf16 %v225_v25, %v224_v22  ;;  %1347 = vmatpush.bf16.msrb.mxu0 %v2313_v23  ;;  %1360 = vmatpush.bf16.msrb.mxu1 %v2321_v24 }
  0xd8   :  { %v1239_v31 = vunpack.c.l.b16 %v234_v28  ;;  %v1240_v32 = vunpack.c.h.b16 %v234_v28  ;;  %v180_v33 = vpop.f32.mrf.mxu0 }
  0xd9   :  { %1180 = vmatpush.bf16.msrb.mxu2 %v2302_v19  ;;  %1193 = vmatpush.bf16.msrb.mxu3 %v2310_v20  ;;  %v181_v34 = vadd.f32 %v180_v33, %v2656_v45  ;;  %v209_v35 = vpop.f32.mrf.mxu1  ;;  %v2298_v45 = vld [vmem:[%s2922_s3 + $0x290] sm:$0xff] }
  0xda   :  { %v210_v38 = vadd.f32 %v209_v35, %v2664_v48  ;;  %v1241_v39 = vpack.c.b16 %v1239_v31, %v1239_v31  ;;  %v1242_v40 = vpack.c.b16 %v1240_v32, %v1240_v32  ;;  %1348 = vmatpush.bf16.msrb.mxu0 %v2312_v29  ;;  %1361 = vmatpush.bf16.msrb.mxu1 %v2320_v30  ;;  %v2306_v48 = vld [vmem:[%s2922_s3 + $0x2d0] sm:$0xff] }
  0xdb   :  { %v226_v41 = vmax.f32 %v181_v34, 0.0 }
  0xdc   :  { %v227_v42 = vmax.f32 %v210_v38, 0.0 }
  0xdd   :  { %1181 = vmatpush.bf16.msrb.mxu2 %v2301_v26  ;;  %1194 = vmatpush.bf16.msrb.mxu3 %v2309_v27 }
  0xde   :  { %v235_v49 = vpack.c.bf16 %v227_v42, %v226_v41  ;;  %1349 = vmatmul.bf16.vlgmr.msrb.gmra.mxu0 %v1241_v39  ;;  %1362 = vmatmul.bf16.vlgmr.msrb.gmra.mxu1 %v1242_v40 }
  0xe0   :  { %v1401_v13 = vunpack.c.l.b16 %v235_v49  ;;  %v1402_v14 = vunpack.c.h.b16 %v235_v49 }
  0xe1   :  { %1182 = vmatpush.bf16.msrb.mxu2 %v2300_v36  ;;  %1195 = vmatpush.bf16.msrb.mxu3 %v2308_v37 }
  0xe2   :  { %v1403_v15 = vpack.c.b16 %v1401_v13, %v1401_v13  ;;  %v1404_v16 = vpack.c.b16 %v1402_v14, %v1402_v14 }
  0xe5   :  { %1183 = vmatpush.bf16.msrb.mxu2 %v2299_v46  ;;  %1196 = vmatpush.bf16.msrb.mxu3 %v2307_v47 }
  0xe9   :  { %1184 = vmatpush.bf16.msrb.mxu2 %v2298_v45  ;;  %1197 = vmatpush.bf16.msrb.mxu3 %v2306_v48 }
  0xed   :  { %1185 = vmatpush.bf16.msrb.mxu2 %v2297_v53  ;;  %1198 = vmatpush.bf16.msrb.mxu3 %v2305_v54 }
  0xf1   :  { %1186 = vmatpush.bf16.msrb.mxu2 %v2296_v57  ;;  %1199 = vmatpush.bf16.msrb.mxu3 %v2304_v58  ;;  %v1536_v58 = vand.u32 127, %v1535_v55 }
  0xf3   :  { %vm1538_vm0 = vcmp.ge.s32.totalorder %v1536_v58, 20  ;;  %vm1539_vm1 = vcmp.lt.s32.totalorder %v1536_v58, 40  ;;  %vm1537_vm3 = vcmp.lt.s32.totalorder %v1536_v58, 20 }
  0xf4   :  { %1187 = vmatmul.bf16.vlgmr.msrb.gmra.mxu2 %v1079_v61  ;;  %1200 = vmatmul.bf16.vlgmr.msrb.gmra.mxu3 %v1080_v62  ;;  %vm2907_vm2 = vmand %vm1538_vm0, %vm1539_vm1 }
  0xf5   :  { %1503 = vmatpush.bf16.msra.mxu2 %v2335_v59  ;;  %1516 = vmatpush.bf16.msra.mxu3 %v2343_v60 }
  0xf9   :  { %1504 = vmatpush.bf16.msra.mxu2 %v2334_v63  ;;  %1517 = vmatpush.bf16.msra.mxu3 %v2342_v0  ;;  %v2344_v63 = vld [vmem:[%s2924_s4] ss:$0 sm:$0xff] }
  0xfd   :  { %1505 = vmatpush.bf16.msra.mxu2 %v2333_v1  ;;  %1518 = vmatpush.bf16.msra.mxu3 %v2341_v2 }
 0x101   :  { %1506 = vmatpush.bf16.msra.mxu2 %v2332_v3  ;;  %1519 = vmatpush.bf16.msra.mxu3 %v2340_v4 }
 0x105   :  { %1507 = vmatpush.bf16.msra.mxu2 %v2331_v5  ;;  %1520 = vmatpush.bf16.msra.mxu3 %v2339_v6 }
 0x109   :  { %1508 = vmatpush.bf16.msra.mxu2 %v2330_v7  ;;  %1521 = vmatpush.bf16.msra.mxu3 %v2338_v8 }
 0x10d   :  { %1509 = vmatpush.bf16.msra.mxu2 %v2329_v9  ;;  %1522 = vmatpush.bf16.msra.mxu3 %v2337_v10 }
 0x111   :  { %1510 = vmatpush.bf16.msra.mxu2 %v2328_v11  ;;  %1523 = vmatpush.bf16.msra.mxu3 %v2336_v12 }
 0x114   :  { %1511 = vmatmul.bf16.vlgmr.msra.gmra.mxu2 %v1403_v15  ;;  %1524 = vmatmul.bf16.vlgmr.msra.gmra.mxu3 %v1404_v16 }
 0x137   :  { %v412_v17 = vpop.f32.mrf.mxu2  ;;  %v425_v18 = vpop.f32.mrf.mxu3 }
 0x138   :  { %v426_v19 = vadd.f32 %v425_v18, %v412_v17 }
 0x139   :  { %v702_v20 = vpop.f32.mrf.mxu0  ;;  %v715_v21 = vpop.f32.mrf.mxu1 }
 0x13a   :  { %v716_v22 = vadd.f32 %v715_v21, %v702_v20 }
 0x13f   :  { %v414_v23 = vpop.f32.mrf.mxu2  ;;  %v427_v24 = vpop.f32.mrf.mxu3 }
 0x141   :  { %v704_v25 = vpop.f32.mrf.mxu0  ;;  %v717_v26 = vpop.f32.mrf.mxu1 }
 0x147   :  { %v541_v27 = vpop.f32.mrf.mxu2  ;;  %v554_v28 = vpop.f32.mrf.mxu3 }
 0x148   :  { %v542_v29 = vadd.f32 %v541_v27, %v426_v19 }
 0x149   :  { %v1026_v30 = vpop.f32.mrf.mxu0  ;;  %v1039_v31 = vpop.f32.mrf.mxu1 }
 0x14a   :  { %v555_v32 = vadd.f32 %v554_v28, %v542_v29  ;;  %v1040_v33 = vadd.f32 %v1039_v31, %v1026_v30 }
 0x14c   :  { %v719_v34 = vadd.f32 %v716_v22, %v555_v32 }
 0x14f   :  { %v543_v35 = vpop.f32.mrf.mxu2  ;;  %v556_v36 = vpop.f32.mrf.mxu3 }
 0x151   :  { %v1028_v37 = vpop.f32.mrf.mxu0  ;;  %v1041_v38 = vpop.f32.mrf.mxu1 }
 0x157   :  { %v864_v39 = vpop.f32.mrf.mxu2  ;;  %v877_v40 = vpop.f32.mrf.mxu3 }
 0x158   :  { %v878_v41 = vadd.f32 %v877_v40, %v864_v39 }
 0x15a   :  { %v881_v42 = vadd.f32 %v878_v41, %v719_v34 }
 0x15b   :  { %v1350_v44 = vpop.f32.mrf.mxu0  ;;  %v1363_v46 = vpop.f32.mrf.mxu1 }
 0x15c   :  { %v1043_v43 = vadd.f32 %v1040_v33, %v881_v42  ;;  %v1364_v57 = vadd.f32 %v1363_v46, %v1350_v44 }
 0x15f   :  { %v866_v47 = vpop.f32.mrf.mxu2  ;;  %v879_v49 = vpop.f32.mrf.mxu3 }
 0x163   :  { %v1352_v50 = vpop.f32.mrf.mxu0  ;;  %v1365_v51 = vpop.f32.mrf.mxu1 }
 0x177   :  { %v1188_v45 = vpop.f32.mrf.mxu2  ;;  %v1201_v48 = vpop.f32.mrf.mxu3 }
 0x178   :  { %v1202_v54 = vadd.f32 %v1201_v48, %v1188_v45 }
 0x17a   :  { %v1205_v56 = vadd.f32 %v1202_v54, %v1043_v43 }
 0x17c   :  { %v1367_v61 = vadd.f32 %v1364_v57, %v1205_v56 }
 0x17f   :  { %v1190_v52 = vpop.f32.mrf.mxu2  ;;  %v1203_v53 = vpop.f32.mrf.mxu3 }
 0x197   :  { %v1512_v59 = vpop.f32.mrf.mxu2  ;;  %v1525_v60 = vpop.f32.mrf.mxu3 }
 0x198   :  { %v1526_v62 = vadd.f32 %v1525_v60, %v1512_v59 }
 0x19a   :  { %v1529_v0 = vadd.f32 %v1526_v62, %v1367_v61 }
 0x19c   :  { %v1534_v2 = vadd.f32 %v2344_v63, %v1529_v0 }
 0x19e   :  { %v1565_v3 = vsel %vm2907_vm2, %v1534_v2, -1e+30  ;;  %v1541_v6 = vsel %vm1537_vm3, %v1534_v2, -1e+30 }
 0x19f   :  { %v1514_v4 = vpop.f32.mrf.mxu2  ;;  %v1527_v5 = vpop.f32.mrf.mxu3  ;;  %1566 = vmax.xlane.f32.xlu0 %v1565_v3 }
 0x1a7   :  { %1542 = vmax.xlane.f32.xlu0 %v1541_v6 }
 0x212   :  { %v1567_v7 = vpop.xlane.xlu0 %1566 }
 0x213   :  { %v1568_v8 = vsub.f32 %v1565_v3, %v1567_v7 }
 0x215   :  { %v1569_v9 = vmul.f32 1.442695, %v1568_v8 }
 0x217   :  { %2345 = vpow2.f32 %v1569_v9 }
 0x21a   :  { %v1543_v10 = vpop.xlane.xlu0 %1542 }
 0x21b   :  { %v1544_v11 = vsub.f32 %v1541_v6, %v1543_v10 }
 0x21d   :  { %v2346_v12 = vpop.eup %2345  ;;  %v1545_v13 = vmul.f32 1.442695, %v1544_v11 }
 0x21e   :  { %v1571_v14 = vsel %vm2907_vm2, %v2346_v12, 0.0 }
 0x21f   :  { %2347 = vpow2.f32 %v1545_v13  ;;  %1572 = vadd.xlane.f32.xlu1 %v1571_v14 }
 0x225   :  { %v2348_v15 = vpop.eup %2347 }
 0x226   :  { %v1547_v16 = vsel %vm1537_vm3, %v2348_v15, 0.0 }
 0x227   :  { %1548 = vadd.xlane.f32.xlu1 %v1547_v16 }
 0x292   :  { %v1573_v17 = vpop.xlane.xlu1 %1572 }
 0x293   :  { %2349 = vrcp.f32 %v1573_v17  ;;  %v1585_v22 = vand.u32 2147483648, %v1573_v17  ;;  %v1583_v24 = vand.u32 2147483647, %v1573_v17  ;;  %vm1579_vm5 = vweird.f32 %v1573_v17 }
 0x295   :  { %v1586_v27 = vor.u32 1.1754944e-38, %v1585_v22  ;;  %vm1584_vm7 = vcmp.eq.f32.partialorder %v1583_v24, 8.507059e+37 }
 0x299   :  { %v2350_v18 = vpop.eup %2349 }
 0x29a   :  { %v1575_v19 = vmul.f32 %v2350_v18, %v1573_v17  ;;  %v1549_v20 = vpop.xlane.xlu1 %1548  ;;  %vm1580_vm4 = vweird.f32 %v2350_v18 }
 0x29b   :  { %2351 = vrcp.f32 %v1549_v20  ;;  %vm1581_vm6 = vmor %vm1579_vm5, %vm1580_vm4  ;;  %v1561_v33 = vand.u32 2147483648, %v1549_v20  ;;  %v1559_v36 = vand.u32 2147483647, %v1549_v20  ;;  %vm1555_vm9 = vweird.f32 %v1549_v20 }
 0x29c   :  { %v1576_v21 = vsub.f32 1.0, %v1575_v19 }
 0x29d   :  { %v1562_v38 = vor.u32 1.1754944e-38, %v1561_v33  ;;  %vm1560_vm11 = vcmp.eq.f32.partialorder %v1559_v36, 8.507059e+37 }
 0x29e   :  { %v1577_v23 = vmul.f32 %v2350_v18, %v1576_v21 }
 0x2a0   :  { %v1578_v25 = vadd.f32 %v2350_v18, %v1577_v23 }
 0x2a1   :  { %v2352_v26 = vpop.eup %2351 }
 0x2a2   :  { %v1551_v28 = vmul.f32 %v2352_v26, %v1549_v20  ;;  %v1582_v29 = vsel %vm1581_vm6, %v2350_v18, %v1578_v25  ;;  %vm1556_vm8 = vweird.f32 %v2352_v26 }
 0x2a3   :  { %v1587_v30 = vsel %vm1584_vm7, %v1586_v27, %v1582_v29  ;;  %vm1557_vm10 = vmor %vm1555_vm9, %vm1556_vm8 }
 0x2a4   :  { %v1552_v31 = vsub.f32 1.0, %v1551_v28  ;;  %v1588_v32 = vmul.f32 %v1587_v30, %v1571_v14 }
 0x2a6   :  { %v1553_v34 = vmul.f32 %v2352_v26, %v1552_v31  ;;  %v1591_v35 = vsel %vm2907_vm2, %v1588_v32, 1.0 }
 0x2a7   :  { %1592 = vmin.xlane.f32.xlu2 %v1591_v35 }
 0x2a8   :  { %v1554_v37 = vadd.f32 %v2352_v26, %v1553_v34 }
 0x2aa   :  { %v1558_v39 = vsel %vm1557_vm10, %v2352_v26, %v1554_v37 }
 0x2ab   :  { %v1563_v40 = vsel %vm1560_vm11, %v1562_v38, %v1558_v39 }
 0x2ac   :  { %v1564_v41 = vmul.f32 %v1563_v40, %v1547_v16 }
 0x2af   :  { %1589 = vmax.xlane.f32.xlu2 %v1564_v41 }
 0x31a   :  { %v1593_v42 = vpop.xlane.xlu2 %1592 }
 0x31b   :  { %v1594_v43 = vadd.f32 0.31, %v1593_v42 }
 0x322   :  { %v1590_v44 = vpop.xlane.xlu2 %1589 }
 0x323   :  { %vm1595_vm12 = vcmp.ge.f32.partialorder %v1590_v44, %v1594_v43 }
 0x324   :  { %v1598_v46 = vsel %vm1595_vm12, %v1564_v41, 0.0 }
 0x325   :  { %1599 = vst [vmem:[%s2925_s5] sm:$0xff] %v1598_v46 }

</bundles_post_ra>
